<compile_context>
chip_gen: v7x
topology: tpu7x:2x2x1
jax: 0.10.0
libtpu: 0.0.40
codegen_flags: <defaults>
</compile_context>

<pallas_src>
import jax
import jax.numpy as jnp
from jax.experimental import pallas as pl
from jax.experimental.pallas import tpu as pltpu


def _leaky_relu(x, negative_slope=0.01):
    # matches torch.nn.functional.leaky_relu default slope
    return jnp.where(x >= 0, x, negative_slope * x)


def _round_up8(v):
    return ((v + 7) // 8) * 8


def gcnn_kernel(x_ref, adj_ref, w1_ref, w2_ref, w3_ref, o_ref):
    """Whole forward pass, one invocation.

    x_ref   : VMEM, (R_in, N) f32  -- channels-first, batch on sublanes,
                                      zero-padded to a multiple of 8 rows
    adj_ref : VMEM, (N, N)         -- A_hat (symmetric), f32 or bf16
    w*_ref  : VMEM, (R_out, R_in) f32 -- zero-padded block-diagonal weights
    o_ref   : VMEM, (B, N) f32     -- sigmoid output (lane-dense)
    """
    adj = adj_ref[...]
    mm_dtype = adj.dtype
    B = o_ref.shape[0]

    def layer(h, w_ref):
        # Channel mix: one dense (R_out, R_in) @ (R_in, N) MXU matmul for the
        # whole batch (block-diagonal weight, f32 operands / f32 accum).
        s = jnp.dot(w_ref[...], h, preferred_element_type=jnp.float32)
        # Graph mix, transposed formulation: H^T = S^T @ adj^T; A_hat is
        # symmetric so adj^T == adj.  bf16 operands (default) / f32 accum.
        return jnp.dot(s.astype(mm_dtype), adj,
                       preferred_element_type=jnp.float32)

    x = x_ref[...].astype(jnp.float32)          # (R_in, N)

    h1 = _leaky_relu(layer(x, w1_ref))          # (R1, N)
    h2 = _leaky_relu(layer(h1, w2_ref))         # (R2, N)
    h3 = layer(h2, w3_ref)                      # (R3, N); rows >= B are zero-padding

    o_ref[...] = jax.nn.sigmoid(h3[:B, :]).astype(o_ref.dtype)


def _block_diag_padded(w, batch, rows_pad, cols_pad):
    """Zero-padded block-diagonal expansion of an nn.Linear weight (C_out, C_in)."""
    c_out, c_in = w.shape
    bd = jnp.kron(jnp.eye(batch, dtype=jnp.float32), jnp.asarray(w, jnp.float32))
    out = jnp.zeros((rows_pad, cols_pad), jnp.float32)
    return out.at[:batch * c_out, :batch * c_in].set(bd)


def prepare_gcnn_params(adj, w1, w2, w3, *, batch, compute_dtype=jnp.bfloat16):
    """One-time parameter prep, hoisted out of the per-call forward path.

    * adj (A_hat) is symmetric -> no transpose; cast ONCE to the MXU operand
      dtype (bf16 by default: native on v5e/v6e/v7x, f32 accumulation in the
      kernel preserves accuracy).
    * nn.Linear weights are expanded to zero-padded block-diagonal matrices so
      each layer's channel contraction is a single dense matmul in-kernel.
    """
    adj_c = jnp.asarray(adj, dtype=compute_dtype)

    r_in = _round_up8(batch * w1.shape[1])
    r1 = _round_up8(batch * w1.shape[0])
    r2 = _round_up8(batch * w2.shape[0])
    r3 = _round_up8(batch * w3.shape[0])

    w1bd = _block_diag_padded(w1, batch, r1, r_in)
    w2bd = _block_diag_padded(w2, batch, r2, r1)
    w3bd = _block_diag_padded(w3, batch, r3, r2)
    return adj_c, w1bd, w2bd, w3bd


@jax.jit
def gcnn_forward(x, adj_c, w1bd, w2bd, w3bd):
    """x: (B, N, C_in); pre-prepared adjacency + block-diag weights.

    Returns (B, N, 1) float32, matching the PyTorch module.
    """
    B, N, C_in = x.shape
    rows_in = w1bd.shape[1]
    r1, r2, r3 = w1bd.shape[0], w2bd.shape[0], w3bd.shape[0]

    # Layout plumbing: channels-first, batch on sublanes, pad rows to R_in.
    xT = jnp.transpose(x, (0, 2, 1)).reshape(B * C_in, N).astype(jnp.float32)
    if xT.shape[0] != rows_in:
        xT = jnp.pad(xT, ((0, rows_in - B * C_in), (0, 0)))

    adj_flops = 2 * N * N * (r1 + r2 + r3)
    chan_flops = 2 * N * (r1 * rows_in + r2 * r1 + r3 * r2)
    bytes_accessed = (rows_in * N * 4
                      + adj_c.size * adj_c.dtype.itemsize
                      + 4 * (w1bd.size + w2bd.size + w3bd.size)
                      + B * N * 4)
    cost = pl.CostEstimate(flops=adj_flops + chan_flops,
                           transcendentals=B * N,
                           bytes_accessed=bytes_accessed)

    # Grid-less: working set < 1 MiB VMEM at this size; a grid would only add
    # per-step overhead.  (On v7x, add a "parallel" batch grid axis only when
    # B / N grow large enough to amortize the ~0.35 us per-step cost.)
    out2d = pl.pallas_call(
        gcnn_kernel,
        out_shape=jax.ShapeDtypeStruct((B, N), jnp.float32),
        in_specs=[
            pl.BlockSpec(memory_space=pltpu.MemorySpace.VMEM),  # x, (R_in, N)
            pl.BlockSpec(memory_space=pltpu.MemorySpace.VMEM),  # adj, (N, N)
            pl.BlockSpec(memory_space=pltpu.MemorySpace.VMEM),  # W1 block-diag
            pl.BlockSpec(memory_space=pltpu.MemorySpace.VMEM),  # W2 block-diag
            pl.BlockSpec(memory_space=pltpu.MemorySpace.VMEM),  # W3 block-diag
        ],
        out_specs=pl.BlockSpec(memory_space=pltpu.MemorySpace.VMEM),
        cost_estimate=cost,
    )(xT, adj_c, w1bd, w2bd, w3bd)

    return out2d[:, :, None]                            # (B, N, 1)


def create_adj_matrix(size):
    """JAX port of the reference create_adj_matrix (normalized Gaussian adjacency)."""
    col, row = jnp.meshgrid(jnp.arange(size), jnp.arange(size))
    coord = jnp.stack((col, row), axis=2).reshape(-1, 2).astype(jnp.float32) / size
    diff = coord[:, None, :] - coord[None, :, :]
    dist = jnp.sqrt(jnp.sum(diff * diff, axis=-1))       # cdist (euclidean)
    sigma_dist = jnp.var(dist, ddof=1)                   # torch.var is unbiased
    A = jnp.exp(-dist ** 2 / sigma_dist)
    A = jnp.where(A <= 1e-05, 0.0, A)
    d = jnp.sum(A, axis=1)
    d_hat = 1.0 / jnp.sqrt(d)                            # sqrt(inv(D)) diagonal
    A_hat = d_hat[:, None] * A * d_hat[None, :]
    return A_hat.astype(jnp.float32)


def gcnn_reference(x, adj, w1, w2, w3):
    """Pure-JAX reference with PyTorch semantics; w_k in (C_out, C_in) layout."""
    h = _leaky_relu(jnp.einsum("nm,bmf->bnf", adj, x @ w1.T))
    h = _leaky_relu(jnp.einsum("nm,bmf->bnf", adj, h @ w2.T))
    h = jnp.einsum("nm,bmf->bnf", adj, h @ w3.T)
    return jax.nn.sigmoid(h)


if __name__ == "__main__":
    # Small shapes consistent with the module: img_size=16 -> N=256 nodes,
    # batch=2, in_features=4.
    img_size = 16
    N = img_size ** 2
    B = 2
    in_features = 4

    key = jax.random.PRNGKey(0)
    kx, k1, k2, k3 = jax.random.split(key, 4)

    x = jax.random.normal(kx, (B, N, in_features), dtype=jnp.float32)
    adj = create_adj_matrix(img_size)

    # Deterministic Linear weights in nn.Linear (out, in) layout.
    w1 = jax.random.normal(k1, (4, in_features), jnp.float32) * 0.5
    w2 = jax.random.normal(k2, (3, 4), jnp.float32) * 0.5
    w3 = jax.random.normal(k3, (1, 3), jnp.float32) * 0.5

    ref = gcnn_reference(x, adj, w1, w2, w3)

    # f32-adjacency path (strict accuracy).
    params_f32 = prepare_gcnn_params(adj, w1, w2, w3, batch=B,
                                     compute_dtype=jnp.float32)
    out_f32 = jax.block_until_ready(gcnn_forward(x, *params_f32))
    assert out_f32.shape == (B, N, 1), out_f32.shape
    assert jnp.allclose(out_f32, ref, atol=1e-3, rtol=1e-3), "f32 mismatch vs reference"

    # bf16-adjacency path (DEFAULT: native MXU dtype on v5e/v6e/v7x), f32 accum.
    params_bf16 = prepare_gcnn_params(adj, w1, w2, w3, batch=B)
    out_bf16 = jax.block_until_ready(gcnn_forward(x, *params_bf16))
    assert out_bf16.shape == (B, N, 1), out_bf16.shape
    assert jnp.allclose(out_bf16, ref, atol=5e-2, rtol=0), "bf16 mismatch vs reference"

    print("KERNEL_OK")
</pallas_src>

<mosaic_0001>
module attributes {stable_mosaic.version = 11 : i64} {
  func.func @gcnn_kernel(%arg0: memref<8x256xf32, #tpu.memory_space<vmem>>, %arg1: memref<256x256xf32, #tpu.memory_space<vmem>>, %arg2: memref<8x8xf32, #tpu.memory_space<vmem>>, %arg3: memref<8x8xf32, #tpu.memory_space<vmem>>, %arg4: memref<8x8xf32, #tpu.memory_space<vmem>>, %arg5: memref<2x256xf32, #tpu.memory_space<vmem>>) attributes {dimension_semantics = [], scalar_prefetch = 0 : i64, scratch_operands = 0 : i64, tpu.core_type = #tpu.core_type<tc>} {
    %c0 = arith.constant 0 : index
    %c0_0 = arith.constant 0 : index
    %0 = vector.load %arg1[%c0, %c0_0] : memref<256x256xf32, #tpu.memory_space<vmem>>, vector<256x256xf32>
    %c0_1 = arith.constant 0 : index
    %c0_2 = arith.constant 0 : index
    %1 = vector.load %arg0[%c0_1, %c0_2] : memref<8x256xf32, #tpu.memory_space<vmem>>, vector<8x256xf32>
    %c0_3 = arith.constant 0 : index
    %c0_4 = arith.constant 0 : index
    %2 = vector.load %arg2[%c0_3, %c0_4] : memref<8x8xf32, #tpu.memory_space<vmem>>, vector<8x8xf32>
    %cst = arith.constant dense<0.000000e+00> : vector<8x256xf32>
    %3 = tpu.matmul %2, %1, %cst {dimension_numbers = #tpu.dot_dimension_numbers<[1], [0], [0], [1], [0, 0, 1, 1], [], []>} : vector<8x8xf32>, vector<8x256xf32>, vector<8x256xf32> -> vector<8x256xf32>
    %cst_5 = arith.constant dense<0.000000e+00> : vector<8x256xf32>
    %4 = tpu.matmul %3, %0, %cst_5 {dimension_numbers = #tpu.dot_dimension_numbers<[1], [0], [0], [1], [0, 0, 1, 1], [], []>} : vector<8x256xf32>, vector<256x256xf32>, vector<8x256xf32> -> vector<8x256xf32>
    %cst_6 = arith.constant 0.000000e+00 : f32
    %5 = vector.broadcast %cst_6 : f32 to vector<8x256xf32>
    %6 = arith.cmpf oge, %4, %5 : vector<8x256xf32>
    %cst_7 = arith.constant 0.00999999977 : f32
    %7 = vector.broadcast %cst_7 : f32 to vector<8x256xf32>
    %8 = arith.mulf %7, %4 : vector<8x256xf32>
    %9 = arith.select %6, %4, %8 : vector<8x256xi1>, vector<8x256xf32>
    %c0_8 = arith.constant 0 : index
    %c0_9 = arith.constant 0 : index
    %10 = vector.load %arg3[%c0_8, %c0_9] : memref<8x8xf32, #tpu.memory_space<vmem>>, vector<8x8xf32>
    %cst_10 = arith.constant dense<0.000000e+00> : vector<8x256xf32>
    %11 = tpu.matmul %10, %9, %cst_10 {dimension_numbers = #tpu.dot_dimension_numbers<[1], [0], [0], [1], [0, 0, 1, 1], [], []>} : vector<8x8xf32>, vector<8x256xf32>, vector<8x256xf32> -> vector<8x256xf32>
    %cst_11 = arith.constant dense<0.000000e+00> : vector<8x256xf32>
    %12 = tpu.matmul %11, %0, %cst_11 {dimension_numbers = #tpu.dot_dimension_numbers<[1], [0], [0], [1], [0, 0, 1, 1], [], []>} : vector<8x256xf32>, vector<256x256xf32>, vector<8x256xf32> -> vector<8x256xf32>
    %cst_12 = arith.constant 0.000000e+00 : f32
    %13 = vector.broadcast %cst_12 : f32 to vector<8x256xf32>
    %14 = arith.cmpf oge, %12, %13 : vector<8x256xf32>
    %cst_13 = arith.constant 0.00999999977 : f32
    %15 = vector.broadcast %cst_13 : f32 to vector<8x256xf32>
    %16 = arith.mulf %15, %12 : vector<8x256xf32>
    %17 = arith.select %14, %12, %16 : vector<8x256xi1>, vector<8x256xf32>
    %c0_14 = arith.constant 0 : index
    %c0_15 = arith.constant 0 : index
    %18 = vector.load %arg4[%c0_14, %c0_15] : memref<8x8xf32, #tpu.memory_space<vmem>>, vector<8x8xf32>
    %cst_16 = arith.constant dense<0.000000e+00> : vector<8x256xf32>
    %19 = tpu.matmul %18, %17, %cst_16 {dimension_numbers = #tpu.dot_dimension_numbers<[1], [0], [0], [1], [0, 0, 1, 1], [], []>} : vector<8x8xf32>, vector<8x256xf32>, vector<8x256xf32> -> vector<8x256xf32>
    %cst_17 = arith.constant dense<0.000000e+00> : vector<8x256xf32>
    %20 = tpu.matmul %19, %0, %cst_17 {dimension_numbers = #tpu.dot_dimension_numbers<[1], [0], [0], [1], [0, 0, 1, 1], [], []>} : vector<8x256xf32>, vector<256x256xf32>, vector<8x256xf32> -> vector<8x256xf32>
    %21 = vector.extract_strided_slice %20 {offsets = [0, 0], sizes = [2, 256], strides = [1, 1]} : vector<8x256xf32> to vector<2x256xf32>
    %22 = arith.negf %21 : vector<2x256xf32>
    %23 = math.exp %22 : vector<2x256xf32>
    %cst_18 = arith.constant 1.000000e+00 : f32
    %24 = vector.broadcast %cst_18 : f32 to vector<2x256xf32>
    %25 = arith.addf %24, %23 : vector<2x256xf32>
    %26 = arith.divf %24, %25 : vector<2x256xf32>
    %c0_19 = arith.constant 0 : index
    %c0_20 = arith.constant 0 : index
    %27 = vector.load %arg5[%c0_19, %c0_20] : memref<2x256xf32, #tpu.memory_space<vmem>>, vector<2x256xf32>
    tpu.vector_store %arg5[%c0_19, %c0_20], %26 {strides = array<i32>} : memref<2x256xf32, #tpu.memory_space<vmem>>, vector<2x256xf32>,
    return
  }
}

</mosaic_0001>

<bundles_post_ra>
// kernel: gcnn_forward.1
= control target key start
LH: loop header
LB: loop body
LE: loop exit
PB: predicated region body
PF: predicated region fallthrough
CT: control target
= control target key end

     0   :  { %10 = vsyncpa [#allocation3], 0  ;;  %s814_s18 = smov [#allocation2]   ;;  %s1044_s0 = inlined_call_operand.vmem [shape: f32[8,256], index: 0, kind: input, shape index: {}]   ;;  %s1045_s1 = inlined_call_operand.hbm [shape: f32[256,256], index: 1, kind: input, shape index: {}]   ;;  %s1046_s2 = inlined_call_operand.vmem [shape: f32[8,8], index: 2, kind: input, shape index: {}]   ;;  %s1047_s3 = inlined_call_operand.vmem [shape: f32[8,8], index: 3, kind: input, shape index: {}]   ;;  %s1048_s4 = inlined_call_operand.vmem [shape: f32[8,8], index: 4, kind: input, shape index: {}]   ;;  %s1049_s5 = inlined_call_operand.vmem [shape: f32[2,256], index: 5, kind: output, shape index: {}]  }
   0x1   :  { %s18_s19 = sshll.u32 %s814_s18, 4  ;;  %s790_s22 = scalar_lea.hbm %s1045_s1, 8192  ;;  %s19_s19 = int_to_ptr.vmem [resolvable:$true] %s18_s19 }
   0x2   :  { %p791_p0 = scmp.ne.s32.totalorder %s1045_s1, %s790_s22  ;;  %p794_p1 = scmp.lt.u32.totalorder %s790_s22, %s1045_s1 }
   0x4   :  { %p796_p2 = pnand %p794_p1, %p791_p0 }
   0x6   :  { %799 = shalt.err (!%p796_p2)
}
   0x7   :  { %s800_s27 = scalar_lea.vmem %s19_s19, 8192  ;;  %p805_p4 = scmp.lt.s32.totalorder %s19_s19, %s19_s19 }
   0x8   :  { %p801_p3 = scmp.ne.s32.totalorder %s19_s19, %s800_s27  ;;  %p806_p5 = scmp.lt.s32.totalorder %s800_s27, %s800_s27 }
   0xa   :  { %p807_p6 = por %p806_p5, %p805_p4 }
   0xc   :  { %p808_p7 = pnand %p807_p6, %p801_p3 }
   0xe   :  { %811 = shalt.err (!%p808_p7)
}
   0xf   :  { %s815_s28 = smov 256   ;;  %s816_s29 = smov 16  }
  0x10   :  { %24 = dma.hbm_to_vmem [thread:$0]  %s1045_s1, 8192, %s19_s19, [#allocation3], %s815_s28, %s815_s28, %s816_s29  }
  0x11   :  { %812 = dma.done.wait [#allocation3], 8192  }
  0x12   :  { %813 = vsyncadd [#allocation3], 4294959104  ;;  %v817_v0 = vmov 0.0   ;;  %v99_v1 = vld [vmem:[%s1044_s0 + $0x8] sm:$0xff]  ;;  %v98_v2 = vld [vmem:[%s1044_s0] sm:$0xff]  ;;  %vm101_vm0 = vcmask 64512  }
  0x13   :  { %169 = vmatprep.mubr.f32.mxu0 %v817_v0  ;;  %v100_v3 = vld [vmem:[%s1046_s2] sm:$0xff]  ;;  %105 = vmatprep.subr.mxu0 %v99_v1  ;;  %v35_v4 = vld [vmem:[#allocation2 + $0x8] sm:$0xff]  ;;  %v37_v5 = vld [vmem:[#allocation2 + $0x18] sm:$0xff] }
  0x14   :  { %v34_v6 = vld [vmem:[#allocation2] sm:$0xff]  ;;  %106 = vmatpush1.msra.mxu0 %v98_v2  ;;  %v870_v7 = vpack.c.bf16 %v37_v5, %v35_v4  ;;  %v36_v8 = vld [vmem:[#allocation2 + $0x10] sm:$0xff]  ;;  %v39_v9 = vld [vmem:[#allocation2 + $0x28] sm:$0xff] }
  0x15   :  { %v41_v10 = vld [vmem:[#allocation2 + $0x38] sm:$0xff]  ;;  %580 = vmatmul.mubr.msk.f32.vlgmr.msra.gmra.mrb[0].mxu0 %vm101_vm0, %v100_v3  ;;  %v873_v11 = vpack.c.bf16 %v36_v8, %v34_v6  ;;  %v38_v13 = vld [vmem:[#allocation2 + $0x20] sm:$0xff]  ;;  %v40_v14 = vld [vmem:[#allocation2 + $0x30] sm:$0xff] }
  0x16   :  { %v875_v12 = vpack.c.bf16 %v41_v10, %v39_v9  ;;  %v43_v15 = vld [vmem:[#allocation2 + $0x48] sm:$0xff]  ;;  %587 = vmatprep.subr.bf16.mxu1 %v870_v7  ;;  %v45_v16 = vld [vmem:[#allocation2 + $0x58] sm:$0xff]  ;;  %321 = vmatprep.mubr.f32.mxu0 %v817_v0  ;;  %v880_v17 = vpack.c.bf16 %v40_v14, %v38_v13  ;;  %v42_v19 = vld [vmem:[#allocation2 + $0x40] sm:$0xff] }
  0x17   :  { %589 = vmatpush1.bf16.msra.mxu1 %v873_v11  ;;  %v883_v18 = vpack.c.bf16 %v45_v16, %v43_v15  ;;  %v44_v20 = vld [vmem:[#allocation2 + $0x50] sm:$0xff]  ;;  %v47_v21 = vld [vmem:[#allocation2 + $0x68] sm:$0xff]  ;;  %v49_v22 = vld [vmem:[#allocation2 + $0x78] sm:$0xff] }
  0x18   :  { %591 = vmatprep.subr.bf16.mxu1 %v875_v12  ;;  %v886_v23 = vpack.c.bf16 %v44_v20, %v42_v19  ;;  %v889_v24 = vpack.c.bf16 %v49_v22, %v47_v21  ;;  %v46_v25 = vld [vmem:[#allocation2 + $0x60] sm:$0xff]  ;;  %v48_v26 = vld [vmem:[#allocation2 + $0x70] sm:$0xff]  ;;  %v51_v27 = vld [vmem:[#allocation2 + $0x88] sm:$0xff] }
  0x19   :  { %v53_v28 = vld [vmem:[#allocation2 + $0x98] sm:$0xff]  ;;  %v892_v29 = vpack.c.bf16 %v48_v26, %v46_v25  ;;  %v50_v31 = vld [vmem:[#allocation2 + $0x80] sm:$0xff]  ;;  %v52_v32 = vld [vmem:[#allocation2 + $0x90] sm:$0xff] }
  0x1a   :  { %v895_v30 = vpack.c.bf16 %v53_v28, %v51_v27  ;;  %v55_v33 = vld [vmem:[#allocation2 + $0xa8] sm:$0xff]  ;;  %v57_v34 = vld [vmem:[#allocation2 + $0xb8] sm:$0xff]  ;;  %v898_v35 = vpack.c.bf16 %v52_v32, %v50_v31  ;;  %v54_v37 = vld [vmem:[#allocation2 + $0xa0] sm:$0xff] }
  0x1b   :  { %593 = vmatpush1.bf16.msra.mxu1 %v880_v17  ;;  %v901_v36 = vpack.c.bf16 %v57_v34, %v55_v33  ;;  %v56_v38 = vld [vmem:[#allocation2 + $0xb0] sm:$0xff]  ;;  %v59_v39 = vld [vmem:[#allocation2 + $0xc8] sm:$0xff]  ;;  %v61_v40 = vld [vmem:[#allocation2 + $0xd8] sm:$0xff] }
  0x1c   :  { %595 = vmatprep.subr.bf16.mxu1 %v883_v18  ;;  %v904_v41 = vpack.c.bf16 %v56_v38, %v54_v37  ;;  %v907_v42 = vpack.c.bf16 %v61_v40, %v59_v39  ;;  %v58_v43 = vld [vmem:[#allocation2 + $0xc0] sm:$0xff]  ;;  %v60_v44 = vld [vmem:[#allocation2 + $0xd0] sm:$0xff]  ;;  %v63_v45 = vld [vmem:[#allocation2 + $0xe8] sm:$0xff] }
  0x1d   :  { %v65_v46 = vld [vmem:[#allocation2 + $0xf8] sm:$0xff]  ;;  %v910_v47 = vpack.c.bf16 %v60_v44, %v58_v43  ;;  %v62_v49 = vld [vmem:[#allocation2 + $0xe0] sm:$0xff]  ;;  %v64_v50 = vld [vmem:[#allocation2 + $0xf0] sm:$0xff] }
  0x1e   :  { %v913_v48 = vpack.c.bf16 %v65_v46, %v63_v45  ;;  %v67_v51 = vld [vmem:[#allocation2 + $0x108] sm:$0xff]  ;;  %v69_v52 = vld [vmem:[#allocation2 + $0x118] sm:$0xff]  ;;  %v916_v53 = vpack.c.bf16 %v64_v50, %v62_v49  ;;  %v66_v55 = vld [vmem:[#allocation2 + $0x100] sm:$0xff] }
  0x1f   :  { %597 = vmatpush1.bf16.msra.mxu1 %v886_v23  ;;  %v919_v54 = vpack.c.bf16 %v69_v52, %v67_v51  ;;  %v68_v56 = vld [vmem:[#allocation2 + $0x110] sm:$0xff]  ;;  %v71_v57 = vld [vmem:[#allocation2 + $0x128] sm:$0xff]  ;;  %v73_v58 = vld [vmem:[#allocation2 + $0x138] sm:$0xff] }
  0x20   :  { %599 = vmatprep.subr.bf16.mxu1 %v889_v24  ;;  %v922_v59 = vpack.c.bf16 %v68_v56, %v66_v55  ;;  %v925_v60 = vpack.c.bf16 %v73_v58, %v71_v57  ;;  %v70_v61 = vld [vmem:[#allocation2 + $0x120] sm:$0xff]  ;;  %v72_v62 = vld [vmem:[#allocation2 + $0x130] sm:$0xff]  ;;  %v75_v63 = vld [vmem:[#allocation2 + $0x148] sm:$0xff] }
  0x21   :  { %v77_v1 = vld [vmem:[#allocation2 + $0x158] sm:$0xff]  ;;  %v928_v2 = vpack.c.bf16 %v72_v62, %v70_v61  ;;  %v74_v4 = vld [vmem:[#allocation2 + $0x140] sm:$0xff]  ;;  %v76_v5 = vld [vmem:[#allocation2 + $0x150] sm:$0xff] }
  0x22   :  { %v931_v3 = vpack.c.bf16 %v77_v1, %v75_v63  ;;  %v79_v6 = vld [vmem:[#allocation2 + $0x168] sm:$0xff]  ;;  %v81_v8 = vld [vmem:[#allocation2 + $0x178] sm:$0xff]  ;;  %v934_v9 = vpack.c.bf16 %v76_v5, %v74_v4  ;;  %v78_v13 = vld [vmem:[#allocation2 + $0x160] sm:$0xff] }
  0x23   :  { %601 = vmatpush1.bf16.msra.mxu1 %v892_v29  ;;  %v937_v10 = vpack.c.bf16 %v81_v8, %v79_v6  ;;  %v80_v14 = vld [vmem:[#allocation2 + $0x170] sm:$0xff]  ;;  %v83_v15 = vld [vmem:[#allocation2 + $0x188] sm:$0xff]  ;;  %v85_v16 = vld [vmem:[#allocation2 + $0x198] sm:$0xff] }
  0x24   :  { %603 = vmatprep.subr.bf16.mxu1 %v895_v30  ;;  %v940_v19 = vpack.c.bf16 %v80_v14, %v78_v13  ;;  %v943_v20 = vpack.c.bf16 %v85_v16, %v83_v15  ;;  %v82_v21 = vld [vmem:[#allocation2 + $0x180] sm:$0xff]  ;;  %v84_v22 = vld [vmem:[#allocation2 + $0x190] sm:$0xff]  ;;  %v87_v25 = vld [vmem:[#allocation2 + $0x1a8] sm:$0xff] }
  0x25   :  { %v89_v26 = vld [vmem:[#allocation2 + $0x1b8] sm:$0xff]  ;;  %v946_v27 = vpack.c.bf16 %v84_v22, %v82_v21  ;;  %v86_v31 = vld [vmem:[#allocation2 + $0x1a0] sm:$0xff]  ;;  %v88_v32 = vld [vmem:[#allocation2 + $0x1b0] sm:$0xff] }
  0x26   :  { %v949_v28 = vpack.c.bf16 %v89_v26, %v87_v25  ;;  %v91_v33 = vld [vmem:[#allocation2 + $0x1c8] sm:$0xff]  ;;  %v93_v34 = vld [vmem:[#allocation2 + $0x1d8] sm:$0xff]  ;;  %v952_v37 = vpack.c.bf16 %v88_v32, %v86_v31  ;;  %v90_v39 = vld [vmem:[#allocation2 + $0x1c0] sm:$0xff] }
  0x27   :  { %605 = vmatpush1.bf16.msra.mxu1 %v898_v35  ;;  %v955_v38 = vpack.c.bf16 %v93_v34, %v91_v33  ;;  %v92_v40 = vld [vmem:[#allocation2 + $0x1d0] sm:$0xff]  ;;  %v95_v43 = vld [vmem:[#allocation2 + $0x1e8] sm:$0xff]  ;;  %v97_v44 = vld [vmem:[#allocation2 + $0x1f8] sm:$0xff] }
  0x28   :  { %607 = vmatprep.subr.bf16.mxu1 %v901_v36  ;;  %v958_v45 = vpack.c.bf16 %v92_v40, %v90_v39  ;;  %v961_v46 = vpack.c.bf16 %v97_v44, %v95_v43  ;;  %v94_v49 = vld [vmem:[#allocation2 + $0x1e0] sm:$0xff]  ;;  %v96_v50 = vld [vmem:[#allocation2 + $0x1f0] sm:$0xff] }
  0x29   :  { %v965_v51 = vpack.c.bf16 %v96_v50, %v94_v49  ;;  %v253_v63 = vld [vmem:[%s1047_s3] sm:$0xff] }
  0x2b   :  { %609 = vmatpush1.bf16.msra.mxu1 %v904_v41 }
  0x2c   :  { %611 = vmatprep.subr.bf16.mxu1 %v907_v42 }
  0x2f   :  { %613 = vmatpush1.bf16.msra.mxu1 %v910_v47 }
  0x30   :  { %615 = vmatprep.subr.bf16.mxu1 %v913_v48 }
  0x33   :  { %617 = vmatpush1.bf16.msra.mxu1 %v916_v53 }
  0x34   :  { %619 = vmatprep.subr.bf16.mxu1 %v919_v54 }
  0x37   :  { %621 = vmatpush1.bf16.msra.mxu1 %v922_v59 }
  0x38   :  { %623 = vmatprep.subr.bf16.mxu1 %v925_v60 }
  0x3b   :  { %625 = vmatpush1.bf16.msra.mxu1 %v928_v2 }
  0x3c   :  { %627 = vmatprep.subr.bf16.mxu1 %v931_v3 }
  0x3f   :  { %629 = vmatpush1.bf16.msra.mxu1 %v934_v9 }
  0x40   :  { %631 = vmatprep.subr.bf16.mxu1 %v937_v10 }
  0x43   :  { %633 = vmatpush1.bf16.msra.mxu1 %v940_v19 }
  0x44   :  { %635 = vmatprep.subr.bf16.mxu1 %v943_v20 }
  0x47   :  { %637 = vmatpush1.bf16.msra.mxu1 %v946_v27 }
  0x48   :  { %639 = vmatprep.subr.bf16.mxu1 %v949_v28 }
  0x4b   :  { %641 = vmatpush1.bf16.msra.mxu1 %v952_v37 }
  0x4c   :  { %643 = vmatprep.subr.bf16.mxu1 %v955_v38 }
  0x4f   :  { %645 = vmatpush1.bf16.msra.mxu1 %v958_v45 }
  0x50   :  { %647 = vmatprep.subr.bf16.mxu1 %v961_v46 }
  0x53   :  { %649 = vmatpush1.bf16.msra.mxu1 %v965_v51 }
  0x54   :  { %715 = vmatprep.subr.bf16.mxu1 %v870_v7 }
  0xe8   :  { %v171_v52 = vpop.f32.mrb[0].mxu0 }
  0xe9   :  { %v173_v55 = vpop.f32.mrb[1].mxu0 }
  0xea   :  { %240 = vmatprep.mubr.f32.mxu1 %v173_v55 }
  0xeb   :  { %241 = vmatmul.mubr.f32.vlgmr.msra.gmra.mrb[0].mxu1 %v171_v52 }
  0xec   :  { %717 = vmatpush1.bf16.msra.mxu1 %v873_v11 }
  0xed   :  { %719 = vmatprep.subr.bf16.mxu1 %v875_v12 }
  0xf0   :  { %721 = vmatpush1.bf16.msra.mxu1 %v880_v17 }
  0xf1   :  { %723 = vmatprep.subr.bf16.mxu1 %v883_v18 }
  0xf4   :  { %725 = vmatpush1.bf16.msra.mxu1 %v886_v23 }
  0xf5   :  { %727 = vmatprep.subr.bf16.mxu1 %v889_v24 }
  0xf8   :  { %729 = vmatpush1.bf16.msra.mxu1 %v892_v29 }
  0xf9   :  { %731 = vmatprep.subr.bf16.mxu1 %v895_v30 }
  0xfc   :  { %733 = vmatpush1.bf16.msra.mxu1 %v898_v35 }
  0xfd   :  { %735 = vmatprep.subr.bf16.mxu1 %v901_v36 }
 0x100   :  { %737 = vmatpush1.bf16.msra.mxu1 %v904_v41 }
 0x101   :  { %739 = vmatprep.subr.bf16.mxu1 %v907_v42 }
 0x104   :  { %741 = vmatpush1.bf16.msra.mxu1 %v910_v47 }
 0x105   :  { %743 = vmatprep.subr.bf16.mxu1 %v913_v48 }
 0x108   :  { %745 = vmatpush1.bf16.msra.mxu1 %v916_v53 }
 0x109   :  { %747 = vmatprep.subr.bf16.mxu1 %v919_v54 }
 0x10c   :  { %749 = vmatpush1.bf16.msra.mxu1 %v922_v59 }
 0x10d   :  { %751 = vmatprep.subr.bf16.mxu1 %v925_v60 }
 0x110   :  { %753 = vmatpush1.bf16.msra.mxu1 %v928_v2 }
 0x111   :  { %755 = vmatprep.subr.bf16.mxu1 %v931_v3 }
 0x114   :  { %757 = vmatpush1.bf16.msra.mxu1 %v934_v9 }
 0x115   :  { %759 = vmatprep.subr.bf16.mxu1 %v937_v10 }
 0x118   :  { %761 = vmatpush1.bf16.msra.mxu1 %v940_v19 }
 0x119   :  { %763 = vmatprep.subr.bf16.mxu1 %v943_v20 }
 0x11c   :  { %765 = vmatpush1.bf16.msra.mxu1 %v946_v27 }
 0x11d   :  { %767 = vmatprep.subr.bf16.mxu1 %v949_v28 }
 0x120   :  { %769 = vmatpush1.bf16.msra.mxu1 %v952_v37 }
 0x121   :  { %771 = vmatprep.subr.bf16.mxu1 %v955_v38 }
 0x124   :  { %773 = vmatpush1.bf16.msra.mxu1 %v958_v45 }
 0x125   :  { %775 = vmatprep.subr.bf16.mxu1 %v961_v46 }
 0x128   :  { %777 = vmatpush1.bf16.msra.mxu1 %v965_v51 }
 0x1be   :  { %v242_v56 = vpop.f32.mrb[0].mxu1 }
 0x1bf   :  { %v249_v57 = vmul.f32 0.01, %v242_v56  ;;  %v244_v58 = vpop.f32.mrb[1].mxu1  ;;  %vm247_vm1 = vcmp.ge.f32.partialorder %v242_v56, 0.0 }
 0x1c0   :  { %vm248_vm2 = vcmp.ge.f32.partialorder %v244_v58, 0.0  ;;  %v250_v61 = vmul.f32 0.01, %v244_v58 }
 0x1c1   :  { %v251_v1 = vsel %vm247_vm1, %v242_v56, %v249_v57 }
 0x1c2   :  { %v252_v62 = vsel %vm248_vm2, %v244_v58, %v250_v61 }
 0x1c3   :  { %257 = vmatprep.subr.mxu0 %v252_v62 }
 0x1c4   :  { %258 = vmatpush1.msra.mxu0 %v251_v1 }
 0x1c5   :  { %581 = vmatmul.mubr.msk.f32.vlgmr.msra.gmra.mrb[2].mxu0 %vm101_vm0, %v253_v63  ;;  %651 = vmatprep.subr.bf16.mxu0 %v870_v7 }
 0x1c6   :  { %653 = vmatpush1.bf16.msra.mxu0 %v873_v11 }
 0x1c7   :  { %655 = vmatprep.subr.bf16.mxu0 %v875_v12 }
 0x1ca   :  { %657 = vmatpush1.bf16.msra.mxu0 %v880_v17 }
 0x1cb   :  { %659 = vmatprep.subr.bf16.mxu0 %v883_v18 }
 0x1ce   :  { %661 = vmatpush1.bf16.msra.mxu0 %v886_v23 }
 0x1cf   :  { %663 = vmatprep.subr.bf16.mxu0 %v889_v24 }
 0x1d2   :  { %665 = vmatpush1.bf16.msra.mxu0 %v892_v29  ;;  %v405_v29 = vld [vmem:[%s1048_s4] sm:$0xff] }
 0x1d3   :  { %667 = vmatprep.subr.bf16.mxu0 %v895_v30 }
 0x1d6   :  { %669 = vmatpush1.bf16.msra.mxu0 %v898_v35 }
 0x1d7   :  { %671 = vmatprep.subr.bf16.mxu0 %v901_v36 }
 0x1da   :  { %673 = vmatpush1.bf16.msra.mxu0 %v904_v41 }
 0x1db   :  { %675 = vmatprep.subr.bf16.mxu0 %v907_v42 }
 0x1de   :  { %677 = vmatpush1.bf16.msra.mxu0 %v910_v47 }
 0x1df   :  { %679 = vmatprep.subr.bf16.mxu0 %v913_v48 }
 0x1e2   :  { %681 = vmatpush1.bf16.msra.mxu0 %v916_v53 }
 0x1e3   :  { %683 = vmatprep.subr.bf16.mxu0 %v919_v54 }
 0x1e6   :  { %685 = vmatpush1.bf16.msra.mxu0 %v922_v59 }
 0x1e7   :  { %687 = vmatprep.subr.bf16.mxu0 %v925_v60 }
 0x1ea   :  { %689 = vmatpush1.bf16.msra.mxu0 %v928_v2 }
 0x1eb   :  { %691 = vmatprep.subr.bf16.mxu0 %v931_v3 }
 0x1ee   :  { %693 = vmatpush1.bf16.msra.mxu0 %v934_v9 }
 0x1ef   :  { %695 = vmatprep.subr.bf16.mxu0 %v937_v10 }
 0x1f2   :  { %697 = vmatpush1.bf16.msra.mxu0 %v940_v19 }
 0x1f3   :  { %699 = vmatprep.subr.bf16.mxu0 %v943_v20 }
 0x1f6   :  { %701 = vmatpush1.bf16.msra.mxu0 %v946_v27 }
 0x1f7   :  { %703 = vmatprep.subr.bf16.mxu0 %v949_v28 }
 0x1fa   :  { %705 = vmatpush1.bf16.msra.mxu0 %v952_v37 }
 0x1fb   :  { %707 = vmatprep.subr.bf16.mxu0 %v955_v38 }
 0x1fe   :  { %709 = vmatpush1.bf16.msra.mxu0 %v958_v45 }
 0x1ff   :  { %711 = vmatprep.subr.bf16.mxu0 %v961_v46 }
 0x202   :  { %713 = vmatpush1.bf16.msra.mxu0 %v965_v51 }
 0x298   :  { %v323_v7 = vpop.f32.mrb[2].mxu0 }
 0x299   :  { %v325_v11 = vpop.f32.mrb[3].mxu0 }
 0x29a   :  { %392 = vmatprep.mubr.f32.mxu0 %v325_v11 }
 0x29b   :  { %393 = vmatmul.mubr.f32.vlgmr.msra.gmra.mrb[4].mxu0 %v323_v7 }
 0x29c   :  { %473 = vmatprep.mubr.f32.mxu0 %v817_v0 }
 0x36e   :  { %v394_v12 = vpop.f32.mrb[4].mxu0 }
 0x36f   :  { %v401_v17 = vmul.f32 0.01, %v394_v12  ;;  %v396_v18 = vpop.f32.mrb[5].mxu0  ;;  %vm399_vm3 = vcmp.ge.f32.partialorder %v394_v12, 0.0 }
 0x370   :  { %vm400_vm4 = vcmp.ge.f32.partialorder %v396_v18, 0.0  ;;  %v402_v23 = vmul.f32 0.01, %v396_v18 }
 0x371   :  { %v403_v30 = vsel %vm399_vm3, %v394_v12, %v401_v17 }
 0x372   :  { %v404_v24 = vsel %vm400_vm4, %v396_v18, %v402_v23 }
 0x373   :  { %409 = vmatprep.subr.mxu0 %v404_v24 }
 0x374   :  { %410 = vmatpush1.msra.mxu0 %v403_v30 }
 0x375   :  { %582 = vmatmul.mubr.msk.f32.vlgmr.msra.gmra.mrb[6].mxu0 %vm101_vm0, %v405_v29 }
 0x448   :  { %v475_v35 = vpop.f32.mrb[6].mxu0 }
 0x449   :  { %v477_v36 = vpop.f32.mrb[7].mxu0 }
 0x44a   :  { %544 = vmatprep.mubr.f32.mxu1 %v477_v36 }
 0x44b   :  { %545 = vmatmul.mubr.f32.vlgmr.msra.gmra.mrb[2].mxu1 %v475_v35 }
 0x51e   :  { %v546_v0 = vpop.f32.mrb[2].mxu1 }
 0x51f   :  { %v583_v41 = vmul.f32 -1.442695, %v546_v0  ;;  %v548_v42 = vpop.f32.mrb[3].mxu1 }
 0x520   :  { %v584_v47 = vmul.f32 -1.442695, %v548_v42 }
 0x521   :  { %782 = vpow2.f32 %v583_v41 }
 0x522   :  { %784 = vpow2.f32 %v584_v47 }
 0x52b   :  { %v783_v48 = vpop.eup %782 }
 0x52c   :  { %v785_v53 = vpop.eup %784  ;;  %v557_v54 = vadd.f32 1.0, %v783_v48 }
 0x52d   :  { %v558_v59 = vadd.f32 1.0, %v785_v53 }
 0x52e   :  { %786 = vrcp.f32 %v557_v54 }
 0x52f   :  { %788 = vrcp.f32 %v558_v59 }
 0x538   :  { %v787_v60 = vpop.eup %786 }
 0x539   :  { %v789_v2 = vpop.eup %788 }
 0x53a   :  { %v565_v3 = vcombine.low %v787_v60, %v789_v2 }
 0x53c   :  { %585 = vst.sshfl [vmem:[%s1049_s5] sm:$0x33 pattern:$0x76325410] %v565_v3 }
 0x53d   :  { %579 = vsyncpa [#allocation3], 1 }

</bundles_post_ra>
